<compile_context>
chip_gen: v7x
topology: tpu7x:2x2x1
jax: 0.10.0
libtpu: 0.0.40
codegen_flags: <defaults>
</compile_context>

<pallas_src>
import jax
import jax.numpy as jnp
from jax.experimental import pallas as pl
from jax.experimental.pallas import tpu as pltpu


def _learnable_sigmoid_kernel(w_ref, x_ref, o_ref):
    # w_ref: (1,) scalar parameter in SMEM; x_ref/o_ref: (tm, L) VMEM tiles.
    # Compute in f32 on all generations (v5e VPU/EUP have no bf16 path); the
    # kernel is HBM-bound so the cast + exp + divide are hidden under the DMA.
    w = jnp.maximum(w_ref[0].astype(jnp.float32), 0.0)          # ReLU(weight)
    x = x_ref[...].astype(jnp.float32)
    y = 1.0 / (1.0 + jnp.exp(-w * x))                           # exact sigmoid(w*x)
    o_ref[...] = y.astype(o_ref.dtype)                          # store in input dtype


def learnable_sigmoid(x, weight, *, lane_width=1024, tile_rows=512):
    """LearnableSigmoid forward pass as a Pallas TPU kernel.

    x: any-rank float array (e.g. NCHW activations, f32 or bf16).
    weight: shape (1,) learnable scalar parameter.

    NOTE: for tensors under a few hundred KiB the per-call overhead dominates
    and letting XLA fuse the elementwise expression is faster; this wrapper
    still runs the Pallas path so the kernel itself is exercised.
    """
    orig_shape = x.shape
    orig_dtype = x.dtype
    total = int(x.size)

    # ---- lane-dense layout: flat -> (M, L) with L a large multiple of 128 ----
    L = int(lane_width)
    padded_total = pl.cdiv(total, L) * L
    flat = x.reshape(-1)
    if padded_total != total:
        # Elementwise op: padded tail is computed and discarded below.
        flat = jnp.pad(flat, (0, padded_total - total))
    M = padded_total // L
    x2d = flat.reshape(M, L)

    # ---- tile sizing: big blocks, but VMEM-safe on every generation ----------
    # tm is either == M (full-dim block, always legal) or a multiple of 8/16,
    # satisfying the (8,128)/(16,128) block-shape constraint.
    tm = M if M < tile_rows else tile_rows
    grid = (pl.cdiv(M, tm),)

    out2d = pl.pallas_call(
        _learnable_sigmoid_kernel,
        out_shape=jax.ShapeDtypeStruct((M, L), orig_dtype),
        grid=grid,
        in_specs=[
            # Scalar parameter lives whole in SMEM (no tiling, no per-step DMA).
            pl.BlockSpec(memory_space=pltpu.MemorySpace.SMEM),
            # Row-tiled, lane-dense input blocks in VMEM.
            pl.BlockSpec((tm, L), lambda i: (i, 0)),
        ],
        out_specs=pl.BlockSpec((tm, L), lambda i: (i, 0)),
        compiler_params=pltpu.CompilerParams(
            # Parallel row axis: no cross-step dependence; shards across the
            # two TensorCores on v7x (near no-op on single-TC v5e/v6e).
            dimension_semantics=("parallel",),
        ),
    )(weight, x2d)

    out_flat = out2d.reshape(-1)
    if padded_total != total:
        out_flat = out_flat[:total]
    return out_flat.reshape(orig_shape)


if __name__ == "__main__":
    key = jax.random.PRNGKey(0)
    # Small NCHW input consistent with a CNN activation map.
    x = jax.random.normal(key, (2, 4, 16, 16), dtype=jnp.float32)

    # Deterministic parameter init: reset_parameters() fills the weight with 1.0.
    weight = jnp.ones((1,), dtype=jnp.float32)

    out = learnable_sigmoid(x, weight)
    out = jax.block_until_ready(out)

    # Pure-JAX reference check (exact PyTorch formula).
    ref = 1.0 / (1.0 + jnp.exp(-jnp.maximum(weight[0], 0.0) * x))
    assert out.shape == x.shape and out.dtype == x.dtype
    assert jnp.allclose(out, ref, atol=1e-6, rtol=1e-6)

    # Also exercise a larger, bf16 activation map to check the tiled path and
    # dtype handling (bf16 kept end-to-end in HBM; f32 compute inside kernel).
    xb = jax.random.normal(jax.random.PRNGKey(1), (4, 32, 160, 160),
                           dtype=jnp.bfloat16)
    outb = jax.block_until_ready(learnable_sigmoid(xb, weight))
    refb = (1.0 / (1.0 + jnp.exp(-jnp.maximum(weight[0], 0.0)
                                 * xb.astype(jnp.float32)))).astype(jnp.bfloat16)
    assert outb.shape == xb.shape and outb.dtype == xb.dtype
    assert jnp.allclose(outb.astype(jnp.float32), refb.astype(jnp.float32),
                        atol=1e-2, rtol=1e-2)

    print("KERNEL_OK")
</pallas_src>

<mosaic_0001>
module attributes {stable_mosaic.version = 11 : i64} {
  func.func @_learnable_sigmoid_kernel(%arg0: i32, %arg1: memref<1xf32, #tpu.memory_space<smem>>, %arg2: memref<2x1024xf32, #tpu.memory_space<vmem>>, %arg3: memref<2x1024xf32, #tpu.memory_space<vmem>>) attributes {dimension_semantics = [#tpu.dimension_semantics<parallel>], iteration_bounds = array<i64: 1>, scalar_prefetch = 0 : i64, scratch_operands = 0 : i64, tpu.core_type = #tpu.core_type<tc>, window_params = [{transform_indices = @transform_0, window_bounds = array<i64: 1>}, {transform_indices = @transform_1, window_bounds = array<i64: 2, 1024>}, {transform_indices = @transform_2, window_bounds = array<i64: 2, 1024>}]} {
    %c0 = arith.constant 0 : index
    %0 = memref.load %arg1[%c0] : memref<1xf32, #tpu.memory_space<smem>>
    %cst = arith.constant 0.000000e+00 : f32
    %1 = arith.maximumf %0, %cst : f32
    %c0_0 = arith.constant 0 : index
    %c0_1 = arith.constant 0 : index
    %2 = vector.load %arg2[%c0_0, %c0_1] : memref<2x1024xf32, #tpu.memory_space<vmem>>, vector<2x1024xf32>
    %cst_2 = arith.constant 0.000000e+00 : f32
    %3 = arith.subf %cst_2, %1 : f32
    %4 = vector.broadcast %3 : f32 to vector<2x1024xf32>
    %5 = arith.mulf %4, %2 : vector<2x1024xf32>
    %6 = math.exp %5 : vector<2x1024xf32>
    %cst_3 = arith.constant 1.000000e+00 : f32
    %7 = vector.broadcast %cst_3 : f32 to vector<2x1024xf32>
    %8 = arith.addf %7, %6 : vector<2x1024xf32>
    %cst_4 = arith.constant 1.000000e+00 : f32
    %9 = vector.broadcast %cst_4 : f32 to vector<2x1024xf32>
    %10 = arith.divf %9, %8 : vector<2x1024xf32>
    %c0_5 = arith.constant 0 : index
    %c0_6 = arith.constant 0 : index
    %11 = vector.load %arg3[%c0_5, %c0_6] : memref<2x1024xf32, #tpu.memory_space<vmem>>, vector<2x1024xf32>
    tpu.vector_store %arg3[%c0_5, %c0_6], %10 {strides = array<i32>} : memref<2x1024xf32, #tpu.memory_space<vmem>>, vector<2x1024xf32>,
    return
  }
  func.func @transform_0(%arg0: i32) -> i32 {
    %c0_i32 = arith.constant 0 : i32
    %c0_i32_0 = arith.constant 0 : i32
    return %c0_i32 : i32
  }
  func.func @transform_1(%arg0: i32) -> (i32, i32) {
    %c0_i32 = arith.constant 0 : i32
    %c0_i32_0 = arith.constant 0 : i32
    return %arg0, %c0_i32 : i32, i32
  }
  func.func @transform_2(%arg0: i32) -> (i32, i32) {
    %c0_i32 = arith.constant 0 : i32
    %c0_i32_0 = arith.constant 0 : i32
    return %arg0, %c0_i32 : i32, i32
  }
}

</mosaic_0001>

<bundles_post_ra>
// kernel: tpu_custom_call.1
= control target key start
LH: loop header
LB: loop body
LE: loop exit
PB: predicated region body
PF: predicated region fallthrough
CT: control target
= control target key end

     0   :  { %8 = vsyncpa [#allocation4], 0  ;;  %s164_s0 = inlined_call_operand.<no memory space> [shape: f32[1], index: 0, kind: input, shape index: {}]   ;;  %s165_s1 = inlined_call_operand.hbm [shape: f32[2,1024], index: 1, kind: input, shape index: {}]   ;;  %s166_s2 = inlined_call_operand.hbm [shape: f32[2,1024], index: 2, kind: output, shape index: {}]  }
   0x1   :  { %9 = vsyncpa [#allocation5], 0  ;;  %s119_s9 = smov [#allocation3]   ;;  %s71_s13 = scalar_lea.hbm %s165_s1, 256 }
   0x2   :  { %s18_s10 = sshll.u32 %s119_s9, 4  ;;  %p72_p0 = scmp.ne.s32.totalorder %s165_s1, %s71_s13  ;;  %s19_s10 = int_to_ptr.vmem [resolvable:$true] %s18_s10 }
   0x3   :  { %p75_p1 = scmp.lt.u32.totalorder %s71_s13, %s165_s1 }
   0x5   :  { %p77_p2 = pnand %p75_p1, %p72_p0 }
   0x7   :  { %80 = shalt.err (!%p77_p2)
}
   0x8   :  { %s81_s18 = scalar_lea.vmem %s19_s10, 256  ;;  %p86_p4 = scmp.lt.s32.totalorder %s19_s10, %s19_s10 }
   0x9   :  { %p82_p3 = scmp.ne.s32.totalorder %s19_s10, %s81_s18  ;;  %p87_p5 = scmp.lt.s32.totalorder %s81_s18, %s81_s18 }
   0xb   :  { %p88_p6 = por %p87_p5, %p86_p4 }
   0xd   :  { %p89_p7 = pnand %p88_p6, %p82_p3 }
   0xf   :  { %92 = shalt.err (!%p89_p7)
}
  0x10   :  { %21 = dma.hbm_to_vmem [thread:$0]  %s165_s1, 256, %s19_s10, [#allocation4]  }
  0x11   :  { %115 = dma.done.wait [#allocation4], 256  }
  0x12   :  { %116 = vsyncadd [#allocation4], 4294967040  ;;  %s120_s21 = smov 0.0   ;;  %v27_v1 = vld [vmem:[#allocation3] sm:$0xff]  ;;  %v28_v2 = vld [vmem:[#allocation3 + $0x8] sm:$0xff]  ;;  %s121_s1 = smov [#allocation6]  }
  0x13   :  { %s26_s24 = smax.f32 %s120_s21, %s164_s0  ;;  %s51_s26 = sshll.u32 %s121_s1, 4  ;;  %s52_s26 = int_to_ptr.vmem [resolvable:$true] %s51_s26 }
  0x14   :  { %s29_s25 = ssub.f32 0.0, %s26_s24  ;;  %s93_s0 = scalar_lea.vmem %s52_s26, 256 }
  0x15   :  { %p94_p8 = scmp.ne.s32.totalorder %s52_s26, %s93_s0  ;;  %p98_p9 = scmp.lt.s32.totalorder %s52_s26, %s52_s26 }
  0x16   :  { %v30_v0 = vstv %s29_s25  ;;  %p99_p10 = scmp.lt.s32.totalorder %s93_s0, %s93_s0 }
  0x17   :  { %v31_v3 = vmul.f32 %v30_v0, %v27_v1  ;;  %v32_v4 = vmul.f32 %v30_v0, %v28_v2 }
  0x18   :  { %p100_p11 = por %p99_p10, %p98_p9 }
  0x19   :  { %v33_v5 = vmul.f32 1.442695, %v31_v3  ;;  %v35_v6 = vmul.f32 1.442695, %v32_v4 }
  0x1a   :  { %p101_p12 = pnand %p100_p11, %p94_p8 }
  0x1b   :  { %63 = vpow2.f32 %v33_v5 }
  0x1c   :  { %65 = vpow2.f32 %v35_v6 }
  0x25   :  { %v64_v7 = vpop.eup %63 }
  0x26   :  { %v66_v8 = vpop.eup %65  ;;  %v37_v9 = vadd.f32 1.0, %v64_v7 }
  0x27   :  { %v38_v10 = vadd.f32 1.0, %v66_v8 }
  0x28   :  { %67 = vrcp.f32 %v37_v9 }
  0x29   :  { %69 = vrcp.f32 %v38_v10 }
  0x32   :  { %v68_v11 = vpop.eup %67 }
  0x33   :  { %v70_v12 = vpop.eup %69  ;;  %43 = vst [vmem:[#allocation6] sm:$0xff] %v68_v11 }
  0x34   :  { %44 = vst [vmem:[#allocation6 + $0x8] sm:$0xff] %v70_v12 }
  0x35   :  { %104 = shalt.err (!%p101_p12)
}
  0x36   :  { %s105_s29 = scalar_lea.hbm %s166_s2, 256 }
  0x37   :  { %p106_p13 = scmp.ne.s32.totalorder %s166_s2, %s105_s29  ;;  %p109_p0 = scmp.lt.u32.totalorder %s105_s29, %s166_s2 }
  0x39   :  { %p111_p1 = pnand %p109_p0, %p106_p13 }
  0x3b   :  { %114 = shalt.err (!%p111_p1)
}
  0x3c   :  { %54 = dma.vmem_to_hbm [thread:$0]  %s52_s26, 256, %s166_s2, [#allocation5]  }
  0x3d   :  { %117 = dma.done.wait [#allocation5], 256  }
  0x3e   :  { %118 = vsyncadd [#allocation5], 4294967040 }
  0x3f   :  { %58 = vsyncpa [#allocation4], 1 }
  0x40   :  { %59 = vsyncpa [#allocation5], 1 }

</bundles_post_ra>
